<compile_context>
chip_gen: v5e
topology: v5e:2x2
jax: 0.10.0
libtpu: 0.0.40
codegen_flags: <defaults>
</compile_context>

<pallas_src>
import jax
import jax.numpy as jnp
from jax.experimental import pallas as pl
from jax.experimental.pallas import tpu as pltpu


def mlp_kernel(x_ref, w1_ref, b1_ref, w2_ref, b2_ref, o_ref):
    # Hoist tile-invariant loads / broadcast sources out of the per-k chain
    # (JAX does not CSE broadcast_in_dim).
    x = x_ref[...]            # (4, TB)   features on sublanes, batch on lanes
    w1 = w1_ref[...]          # (128, 4)  torch-native (out_features, in_features)
    b1 = b1_ref[...]          # (128, 1)  per-sublane bias
    w2 = w2_ref[...]          # (128, 1)  per-sublane layer-2 weight

    # ---- Layer 1 on the VPU: h[j, b] = sum_k W1[j, k] * x[k, b], accumulated
    # in (H, TB) layout.  Each term = (per-sublane w1 column, lane-broadcast
    # once per k independent of TB) * (lane-dense x row, cheap sublane read).
    k_in = x.shape[0]
    h = w1[:, 0:1] * x[0:1, :]                        # (128, TB)
    for k in range(1, k_in):                          # static unroll: 3 FMAs
        h = h + w1[:, k:k + 1] * x[k:k + 1, :]
    h = jnp.maximum(h + b1, 0.0)                      # bias + ReLU

    # ---- Layer 2: per-sublane weight then a sublane-axis reduction straight
    # to the lane-dense (1, TB) output row.  No transpose needed in this layout.
    y = jnp.sum(h * w2, axis=0, keepdims=True)        # (1, TB)
    o_ref[...] = (y + b2_ref[0, 0]).astype(o_ref.dtype)


def _round_up(n, m):
    return ((n + m - 1) // m) * m


def mlp_forward(x, w1, b1, w2, b2, *, tile_b=1024):
    """x: (B, 4). Torch-native params: w1 (128, 4), b1 (128,), w2 (1, 128), b2 (1,)."""
    B, K = x.shape
    H = w1.shape[0]
    assert tile_b % 128 == 0, "tile_b must be a multiple of 128"

    # Tile selection: lane-dense 128-multiples; aim for >= 2 grid steps so the
    # "parallel" batch axis engages both v7x TensorCores (no-op on v5e/v6e).
    tb = min(tile_b, max(128, _round_up(pl.cdiv(B, 2), 128)))
    Bp = _round_up(B, tb)
    grid = (Bp // tb,)

    # Lane-dense x: (B, 4) -> (4, Bp); pad the ragged tail (cropped below).
    x_t = x.T
    if Bp != B:
        x_t = jnp.pad(x_t, ((0, 0), (0, Bp - B)))

    b1_col = b1.reshape(H, 1).astype(jnp.float32)
    w2_col = w2.reshape(H, 1).astype(jnp.float32)     # torch (1,128) -> per-sublane column
    b2_s = jnp.asarray(b2, jnp.float32).reshape(1, 1)

    out = pl.pallas_call(
        mlp_kernel,
        out_shape=jax.ShapeDtypeStruct((1, Bp), jnp.float32),
        grid=grid,
        in_specs=[
            pl.BlockSpec((K, tb), lambda i: (0, i)),            # x: streamed, lane-dense
            pl.BlockSpec((H, K), lambda i: (0, 0)),             # w1: VMEM-resident
            pl.BlockSpec((H, 1), lambda i: (0, 0)),             # b1: resident
            pl.BlockSpec((H, 1), lambda i: (0, 0)),             # w2: resident
            pl.BlockSpec(memory_space=pltpu.MemorySpace.SMEM),  # b2: scalar
        ],
        out_specs=pl.BlockSpec((1, tb), lambda i: (0, i)),      # lane-dense output row
        compiler_params=pltpu.CompilerParams(
            dimension_semantics=("parallel",)),                 # v7x: split over 2 TCs
    )(x_t, w1, b1_col, w2_col, b2_s)

    # (1, Bp) row-major == batch order -> (B, 1), matching nn.Linear output.
    return out.reshape(Bp, 1)[:B]


def init_params(key):
    # nn.Linear default init: U(-1/sqrt(fan_in), +1/sqrt(fan_in)); torch layouts.
    k1, k2, k3, k4 = jax.random.split(key, 4)
    in1, hid, out = 4, 128, 1
    bound1 = 1.0 / (in1 ** 0.5)
    bound2 = 1.0 / (hid ** 0.5)
    w1 = jax.random.uniform(k1, (hid, in1), jnp.float32, -bound1, bound1)  # (out, in)
    b1 = jax.random.uniform(k2, (hid,), jnp.float32, -bound1, bound1)
    w2 = jax.random.uniform(k3, (out, hid), jnp.float32, -bound2, bound2)  # (out, in)
    b2 = jax.random.uniform(k4, (out,), jnp.float32, -bound2, bound2)
    return w1, b1, w2, b2


if __name__ == "__main__":
    key = jax.random.PRNGKey(0)
    k_x, k_p = jax.random.split(key)
    w1, b1, w2, b2 = init_params(k_p)

    def ref_fn(xx):
        return jnp.maximum(xx @ w1.T + b1, 0.0) @ w2.T + b2

    # batch=256 exercises the multi-tile path (grid=(2,), both v7x TCs);
    # batch=100 exercises the padded single-tile path (B not a 128 multiple).
    for batch in (256, 100):
        x = jax.random.normal(jax.random.fold_in(k_x, batch), (batch, 4), jnp.float32)
        y = mlp_forward(x, w1, b1, w2, b2)
        jax.block_until_ready(y)
        ref = ref_fn(x)
        assert y.shape == (batch, 1)
        assert jnp.allclose(y, ref, atol=1e-4, rtol=1e-4), float(jnp.max(jnp.abs(y - ref)))

    print("KERNEL_OK")
</pallas_src>

<mosaic_0001>
module attributes {stable_mosaic.version = 11 : i64} {
  func.func @mlp_kernel(%arg0: i32, %arg1: memref<4x128xf32, #tpu.memory_space<vmem>>, %arg2: memref<128x4xf32, #tpu.memory_space<vmem>>, %arg3: memref<128x1xf32, #tpu.memory_space<vmem>>, %arg4: memref<128x1xf32, #tpu.memory_space<vmem>>, %arg5: memref<1x1xf32, #tpu.memory_space<smem>>, %arg6: memref<1x128xf32, #tpu.memory_space<vmem>>) attributes {dimension_semantics = [#tpu.dimension_semantics<parallel>], iteration_bounds = array<i64: 2>, scalar_prefetch = 0 : i64, scratch_operands = 0 : i64, tpu.core_type = #tpu.core_type<tc>, window_params = [{transform_indices = @transform_0, window_bounds = array<i64: 4, 128>}, {pipeline_mode = #tpu.pipeline_mode<synchronous>, transform_indices = @transform_1, window_bounds = array<i64: 128, 4>}, {pipeline_mode = #tpu.pipeline_mode<synchronous>, transform_indices = @transform_2, window_bounds = array<i64: 128, 1>}, {pipeline_mode = #tpu.pipeline_mode<synchronous>, transform_indices = @transform_3, window_bounds = array<i64: 128, 1>}, {transform_indices = @transform_4, window_bounds = array<i64: 1, 1>}, {transform_indices = @transform_5, window_bounds = array<i64: 1, 128>}]} {
    %c0 = arith.constant 0 : index
    %c0_0 = arith.constant 0 : index
    %0 = vector.load %arg1[%c0, %c0_0] : memref<4x128xf32, #tpu.memory_space<vmem>>, vector<4x128xf32>
    %c0_1 = arith.constant 0 : index
    %c0_2 = arith.constant 0 : index
    %1 = vector.load %arg2[%c0_1, %c0_2] : memref<128x4xf32, #tpu.memory_space<vmem>>, vector<128x4xf32>
    %c0_3 = arith.constant 0 : index
    %c0_4 = arith.constant 0 : index
    %2 = vector.load %arg3[%c0_3, %c0_4] : memref<128x1xf32, #tpu.memory_space<vmem>>, vector<128x1xf32>
    %c0_5 = arith.constant 0 : index
    %c0_6 = arith.constant 0 : index
    %3 = vector.load %arg4[%c0_5, %c0_6] : memref<128x1xf32, #tpu.memory_space<vmem>>, vector<128x1xf32>
    %4 = vector.extract_strided_slice %1 {offsets = [0, 0], sizes = [128, 1], strides = [1, 1]} : vector<128x4xf32> to vector<128x1xf32>
    %5 = vector.extract_strided_slice %0 {offsets = [0, 0], sizes = [1, 128], strides = [1, 1]} : vector<4x128xf32> to vector<1x128xf32>
    %6 = vector.broadcast %4 : vector<128x1xf32> to vector<128x128xf32>
    %7 = vector.broadcast %5 : vector<1x128xf32> to vector<128x128xf32>
    %8 = arith.mulf %6, %7 : vector<128x128xf32>
    %9 = vector.extract_strided_slice %1 {offsets = [0, 1], sizes = [128, 1], strides = [1, 1]} : vector<128x4xf32> to vector<128x1xf32>
    %10 = vector.extract_strided_slice %0 {offsets = [1, 0], sizes = [1, 128], strides = [1, 1]} : vector<4x128xf32> to vector<1x128xf32>
    %11 = vector.broadcast %9 : vector<128x1xf32> to vector<128x128xf32>
    %12 = vector.broadcast %10 : vector<1x128xf32> to vector<128x128xf32>
    %13 = arith.mulf %11, %12 : vector<128x128xf32>
    %14 = arith.addf %8, %13 : vector<128x128xf32>
    %15 = vector.extract_strided_slice %1 {offsets = [0, 2], sizes = [128, 1], strides = [1, 1]} : vector<128x4xf32> to vector<128x1xf32>
    %16 = vector.extract_strided_slice %0 {offsets = [2, 0], sizes = [1, 128], strides = [1, 1]} : vector<4x128xf32> to vector<1x128xf32>
    %17 = vector.broadcast %15 : vector<128x1xf32> to vector<128x128xf32>
    %18 = vector.broadcast %16 : vector<1x128xf32> to vector<128x128xf32>
    %19 = arith.mulf %17, %18 : vector<128x128xf32>
    %20 = arith.addf %14, %19 : vector<128x128xf32>
    %21 = vector.extract_strided_slice %1 {offsets = [0, 3], sizes = [128, 1], strides = [1, 1]} : vector<128x4xf32> to vector<128x1xf32>
    %22 = vector.extract_strided_slice %0 {offsets = [3, 0], sizes = [1, 128], strides = [1, 1]} : vector<4x128xf32> to vector<1x128xf32>
    %23 = vector.broadcast %21 : vector<128x1xf32> to vector<128x128xf32>
    %24 = vector.broadcast %22 : vector<1x128xf32> to vector<128x128xf32>
    %25 = arith.mulf %23, %24 : vector<128x128xf32>
    %26 = arith.addf %20, %25 : vector<128x128xf32>
    %27 = vector.broadcast %2 : vector<128x1xf32> to vector<128x128xf32>
    %28 = arith.addf %26, %27 : vector<128x128xf32>
    %cst = arith.constant 0.000000e+00 : f32
    %29 = vector.broadcast %cst : f32 to vector<128x128xf32>
    %30 = arith.maximumf %28, %29 : vector<128x128xf32>
    %31 = vector.broadcast %3 : vector<128x1xf32> to vector<128x128xf32>
    %32 = arith.mulf %30, %31 : vector<128x128xf32>
    %cst_7 = arith.constant dense<0.000000e+00> : vector<128xf32>
    %33 = vector.multi_reduction <add>, %32, %cst_7 [0] : vector<128x128xf32> to vector<128xf32>
    %34 = vector.shape_cast %33 : vector<128xf32> to vector<1x128xf32>
    %c0_8 = arith.constant 0 : index
    %c0_9 = arith.constant 0 : index
    %35 = memref.load %arg5[%c0_8, %c0_9] : memref<1x1xf32, #tpu.memory_space<smem>>
    %36 = vector.broadcast %35 : f32 to vector<1x128xf32>
    %37 = arith.addf %34, %36 : vector<1x128xf32>
    %c0_10 = arith.constant 0 : index
    %c0_11 = arith.constant 0 : index
    %38 = vector.load %arg6[%c0_10, %c0_11] : memref<1x128xf32, #tpu.memory_space<vmem>>, vector<1x128xf32>
    tpu.vector_store %arg6[%c0_10, %c0_11], %37 {strides = array<i32>} : memref<1x128xf32, #tpu.memory_space<vmem>>, vector<1x128xf32>,
    return
  }
  func.func @transform_0(%arg0: i32) -> (i32, i32) {
    %c0_i32 = arith.constant 0 : i32
    %c0_i32_0 = arith.constant 0 : i32
    return %c0_i32, %arg0 : i32, i32
  }
  func.func @transform_1(%arg0: i32) -> (i32, i32) {
    %c0_i32 = arith.constant 0 : i32
    %c0_i32_0 = arith.constant 0 : i32
    %c0_i32_1 = arith.constant 0 : i32
    return %c0_i32, %c0_i32_0 : i32, i32
  }
  func.func @transform_2(%arg0: i32) -> (i32, i32) {
    %c0_i32 = arith.constant 0 : i32
    %c0_i32_0 = arith.constant 0 : i32
    %c0_i32_1 = arith.constant 0 : i32
    return %c0_i32, %c0_i32_0 : i32, i32
  }
  func.func @transform_3(%arg0: i32) -> (i32, i32) {
    %c0_i32 = arith.constant 0 : i32
    %c0_i32_0 = arith.constant 0 : i32
    %c0_i32_1 = arith.constant 0 : i32
    return %c0_i32, %c0_i32_0 : i32, i32
  }
  func.func @transform_4(%arg0: i32) -> (i32, i32) {
    %c0_i32 = arith.constant 0 : i32
    %c0_i32_0 = arith.constant 0 : i32
    %c0_i32_1 = arith.constant 0 : i32
    return %c0_i32, %c0_i32_0 : i32, i32
  }
  func.func @transform_5(%arg0: i32) -> (i32, i32) {
    %c0_i32 = arith.constant 0 : i32
    %c0_i32_0 = arith.constant 0 : i32
    return %c0_i32, %arg0 : i32, i32
  }
}

</mosaic_0001>

<bundles_post_ra>
// kernel: tpu_custom_call.1
= control target key start
LH: loop header
LB: loop body
LE: loop exit
PB: predicated region body
PF: predicated region fallthrough
CT: control target
= control target key end

     0   :  { %s1654_s0 = inlined_call_operand.vmem [shape: f32[4,256], index: 0, kind: input, shape index: {}]   ;;  %s1655_s1 = inlined_call_operand.vmem [shape: f32[128,4], index: 1, kind: input, shape index: {}]   ;;  %s1656_s2 = inlined_call_operand.vmem [shape: f32[128,1], index: 2, kind: input, shape index: {}]   ;;  %s1657_s3 = inlined_call_operand.vmem [shape: f32[128,1], index: 3, kind: input, shape index: {}]   ;;  %s1658_s4 = inlined_call_operand.<no memory space> [shape: f32[1,1], index: 4, kind: input, shape index: {}]   ;;  %s1659_s5 = inlined_call_operand.hbm [shape: f32[1,256], index: 5, kind: output, shape index: {}]  }
   0x1   :  { %10 = sst [smem:[#allocation2]] %s1658_s4 }
   0x2   :  { %11 = vsyncpa [#allocation4], 0 }
   0x3   :  { %13 = vsyncpa [#allocation4 + $0x1], 0  ;;  %s1123_s20 = smov 0   ;;  %s1125_s21 = smov 0  }
   0x4   :  { %s1127_s22 = smov 0   ;;  %s1129_s23 = smov 0  }
   0x5 LB: > { %s1144_s4 = sadd.s32 4294967295, %s1084_s23   ;;  %s958_s24 = sadd.s32 4294967294, %s1084_s23   ;;  %s1084_s23 = sphi %s1129_s23, %s1665_s23   ;;  %s1080_s22 = sphi %s1127_s22, %s1664_s22   ;;  %s1076_s21 = sphi %s1125_s21, %s1663_s21   ;;  %s1072_s20 = sphi %s1123_s20, %s1662_s20  }
   0x6   : > { %s1148_s25 = sadd.s32 1, %s1084_s23   ;;  %s136_s26 = sadd.s32 1, %s1080_s22 }
   0x7   : > { %s133_s27 = ssub.s32 %s1084_s23, %s1148_s25  ;;  %p146_p0 = scmp.ne.s32.totalorder %s1080_s22, %s1076_s21 }
   0x8   : > { %p134_p1 = scmp.eq.s32.totalorder %s133_s27, 0  ;;  %p147_p2 = scmp.eq.s32.totalorder %s1144_s4, 1 }
   0x9   : > { %p152_p3 = scmp.ne.s32.totalorder %s1076_s21, %s1072_s20  ;;  %p153_p4 = scmp.eq.s32.totalorder %s958_s24, 1 }
   0xa   : > { %s1159_s28 = scalar_select %p134_p1, %s1080_s22, %s136_s26  }
   0xb   : > { %p1161_p5 = por %p147_p2, %p146_p0  ;;  %p1165_p6 = por %p153_p4, %p152_p3 }
   0xc   : > { %p961_p7 = scmp.ge.s32.totalorder %s1084_s23, 1  ;;  %p190_p8 = scmp.lt.s32.totalorder %s1084_s23, 3 }
   0xe   : > { %p191_p9 = pnand %p961_p7, %p190_p8 }
   0xf   : > { %p216_p10 = scmp.lt.s32.totalorder (!%p191_p9), %s1144_s4, 1  ;;  %s214_s6 = sand.u32 (!%p191_p9), 1, %s1076_s21  }
  0x10   : > { %194 = sbr.rel (%p191_p9) target bundleno = 424 (0x1a8), region = 40  ;;  %s899_s9 = scalar_lea.hbm (!%p191_p9), %s1659_s5, %s1144_s4 }
  0x11   : > { %s215_s10 = scalar_lea.vmem (!%p191_p9), [#allocation3], %s214_s6  ;;  %s903_s12 = sshll.u32 (!%p191_p9), %s899_s9, 4  ;;  %s904_s12 = int_to_ptr.hbm [resolvable:$true] %s903_s12 }
  0x12   : > { %s901_s11 = sshll.u32 (!%p191_p9), %s215_s10, 4  ;;  %s891_s13 = scalar_lea.sflag (!%p191_p9), [#allocation4], %s214_s6  ;;  %s902_s11 = int_to_ptr.vmem [resolvable:$true] %s901_s11 }
  0x13   : > { %s1036_s14 = sshra.s32 (!%p191_p9), %s904_s12, 4  ;;  %s1042_s17 = scalar_lea.hbm (!%p191_p9), %s1659_s5, 2  ;;  %s1037_s14 = int_to_ptr.hbm [resolvable:$true] %s1036_s14 }
  0x14   : > { %s1038_s15 = scalar_lea.hbm (!%p191_p9), %s1037_s14, 1  ;;  %p1043_p0 = scmp.lt.s32.totalorder (!%p191_p9), %s1037_s14, %s1659_s5 }
  0x15   : > { %v1174_v0 = vld [vmem:[%s1655_s1 + $0x20] sm:$0xff]  ;;  %v1179_v1 = vld [vmem:[%s1655_s1 + $0x10] sm:$0xff]  ;;  %v1086_v2 = vmov 1   ;;  %v1087_v3 = vmov 0   ;;  %v1189_v4 = vld [vmem:[%s1655_s1 + $0x28] sm:$0xff]  ;;  %v1088_v13 = vmov 2   ;;  %p1039_p11 = scmp.ne.s32.totalorder %s1037_s14, %s1038_s15  ;;  %p1044_p1 = scmp.lt.s32.totalorder %s1042_s17, %s1038_s15 }
  0x16   : > { %1012 = vset.pattern.permute.xlu0 %v1086_v2  ;;  %1009 = vset.pattern.permute.xlu2 %v1087_v3  ;;  %v1194_v5 = vld [vmem:[%s1655_s1 + $0x38] sm:$0xff]  ;;  %v1207_v7 = vld [vmem:[%s1655_s1 + $0x40] sm:$0xff]  ;;  %v1212_v8 = vld [vmem:[%s1655_s1 + $0x50] sm:$0xff]  ;;  %v1089_v18 = vmov 3   ;;  %s217_s26 = scalar_select %p216_p10, %s1144_s4, 1 }
  0x17   : > { %1008 = vset.pattern.permute.xlu1 %v1087_v3  ;;  %291 = vperm.xlu2 %1009, %v1174_v0   ;;  %v1199_v6 = vld [vmem:[%s1655_s1 + $0x18] sm:$0xff]  ;;  %v1225_v10 = vld [vmem:[%s1655_s1 + $0x68] sm:$0xff]  ;;  %v1233_v11 = vld [vmem:[%s1655_s1 + $0x70] sm:$0xff]  ;;  %p1040_p12 = pnand %p1039_p11, %p1161_p5  ;;  %p1045_p2 = por %p1044_p1, %p1043_p0 }
  0x18   : > { %375 = vperm.xlu0 %1012, %v1179_v1   ;;  %281 = vperm.xlu1 %1008, %v1179_v1   ;;  %v1220_v9 = vld [vmem:[%s1655_s1 + $0x58] sm:$0xff]  ;;  %v1238_v12 = vld [vmem:[%s1655_s1] sm:$0xff]  ;;  %v222_v14 = vld [vmem:[%s1655_s1 + $0x8] sm:$0xff]  ;;  %s962_s27 = sshll.u32 %s217_s26, 2 }
  0x19   : > { %v227_v15 = vld [vmem:[%s1655_s1 + $0x30] sm:$0xff]  ;;  %v1259_v16 = vld [vmem:[%s1655_s1 + $0x48] sm:$0xff]  ;;  %v1267_v17 = vld [vmem:[%s1655_s1 + $0x60] sm:$0xff]  ;;  %s219_s8 = scalar_lea.vmem %s1654_s0, %s962_s27  ;;  %s886_s27 = sld [smem:[#allocation2]] }
  0x1a   : > { %v1274_v19 = vld [vmem:[%s1655_s1 + $0x78] sm:$0xff]  ;;  %v1294_v23 = vld [vmem:[%s219_s8] sm:$0xf]  ;;  %v239_v59 = vld [vmem:[%s1656_s2 + $0x10] sm:$0xff]  ;;  %p1041_p13 = pneg %p1040_p12 }
  0x1b   : > { %v1297_v24 = vperm.slane %v1294_v23, 0  ;;  %v1300_v25 = vperm.slane %v1294_v23, 1 }
  0x1c   : > { %p1046_p3 = pnand %p1045_p2, %p1041_p13 }
  0x1f   : > { %296 = vperm.xlu2 %1009, %v1189_v4  }
  0x20   : > { %395 = vperm.xlu0 %1012, %v1194_v5   ;;  %286 = vperm.xlu1 %1008, %v1199_v6  }
  0x27   : > { %311 = vperm.xlu2 %1009, %v1207_v7  }
  0x28   : > { %407 = vperm.xlu0 %1012, %v1212_v8   ;;  %306 = vperm.xlu1 %1008, %v1194_v5  }
  0x2f   : > { %326 = vperm.xlu2 %1009, %v1220_v9  }
  0x30   : > { %419 = vperm.xlu0 %1012, %v1225_v10   ;;  %321 = vperm.xlu1 %1008, %v1212_v8  }
  0x37   : > { %341 = vperm.xlu2 %1009, %v1233_v11  }
  0x38   : > { %1013 = vset.pattern.permute.xlu0 %v1088_v13  ;;  %336 = vperm.xlu1 %1008, %v1225_v10  }
  0x39   : > { %464 = vperm.xlu0 %1013, %v1238_v12  }
  0x3f   : > { %1011 = vset.pattern.permute.xlu2 %v1086_v2 }
  0x40   : > { %1010 = vset.pattern.permute.xlu1 %v1086_v2  ;;  %371 = vperm.xlu2 %1011, %v222_v14   ;;  %v244_v2 = vld [vmem:[%s1656_s2 + $0x38] sm:$0xff] }
  0x41   : > { %484 = vperm.xlu0 %1013, %v1189_v4   ;;  %367 = vperm.xlu1 %1010, %v1238_v12  }
  0x48   : > { %383 = vperm.xlu2 %1011, %v1174_v0  }
  0x49   : > { %496 = vperm.xlu0 %1013, %v1207_v7   ;;  %379 = vperm.xlu1 %1010, %v1199_v6  }
  0x50   : > { %391 = vperm.xlu2 %1011, %v227_v15  }
  0x51   : > { %508 = vperm.xlu0 %1013, %v1220_v9   ;;  %387 = vperm.xlu1 %1010, %v1189_v4  }
  0x58   : > { %403 = vperm.xlu2 %1011, %v1259_v16  }
  0x59   : > { %520 = vperm.xlu0 %1013, %v1233_v11   ;;  %399 = vperm.xlu1 %1010, %v1207_v7  }
  0x60   : > { %415 = vperm.xlu2 %1011, %v1267_v17  }
  0x61   : > { %1017 = vset.pattern.permute.xlu0 %v1089_v18  ;;  %411 = vperm.xlu1 %1010, %v1220_v9  }
  0x62   : > { %565 = vperm.xlu0 %1017, %v222_v14  }
  0x68   : > { %427 = vperm.xlu2 %1011, %v1274_v19  }
  0x69   : > { %423 = vperm.xlu1 %1010, %v1233_v11  }
  0x6a   : > { %585 = vperm.xlu0 %1017, %v227_v15  }
  0x70   : > { %1015 = vset.pattern.permute.xlu2 %v1088_v13 }
  0x71   : > { %1014 = vset.pattern.permute.xlu1 %v1088_v13  ;;  %v292_v20 = vpop.permute.xlu2 %291  ;;  %472 = vperm.xlu2 %1015, %v1179_v1  }
  0x72   : > { %597 = vperm.xlu0 %1017, %v1259_v16   ;;  %468 = vperm.xlu1 %1014, %v222_v14   ;;  %v354_v46 = vmul.f32 %v1297_v24, %v292_v20 }
  0x79   : > { %v1281_v21 = vpop.permute.xlu2 %296  ;;  %480 = vperm.xlu2 %1015, %v1174_v0  }
  0x7a   : > { %609 = vperm.xlu0 %1017, %v1267_v17   ;;  %476 = vperm.xlu1 %1014, %v1199_v6  }
  0x81   : > { %v1290_v22 = vpop.permute.xlu2 %311  ;;  %492 = vperm.xlu2 %1015, %v1194_v5  }
  0x82   : > { %621 = vperm.xlu0 %1017, %v1274_v19   ;;  %488 = vperm.xlu1 %1014, %v227_v15   ;;  %v358_v20 = vmul.f32 %v1297_v24, %v1290_v22  ;;  %v240_v22 = vld [vmem:[%s1656_s2 + $0x18] sm:$0xff] }
  0x89   : > { %v1302_v26 = vpop.permute.xlu2 %326  ;;  %504 = vperm.xlu2 %1015, %v1212_v8  }
  0x8a   : > { %v376_v27 = vpop.permute.xlu0 %375  ;;  %v282_v28 = vpop.permute.xlu1 %281  ;;  %1019 = vset.pattern.permute.xlu0 %v1087_v3  ;;  %500 = vperm.xlu1 %1014, %v1259_v16  }
  0x8b   : > { %v433_v29 = vmul.f32 %v1300_v25, %v376_v27  ;;  %v352_v30 = vmul.f32 %v1297_v24, %v282_v28  ;;  %271 = vperm.xlu0 %1019, %v1238_v12  }
  0x8d   : > { %v1310_v31 = vadd.f32 %v433_v29, %v352_v30  ;;  %v241_v30 = vld [vmem:[%s1656_s2 + $0x20] sm:$0xff] }
  0x91   : > { %v1312_v32 = vpop.permute.xlu2 %341  ;;  %516 = vperm.xlu2 %1015, %v1225_v10  }
  0x92   : > { %v287_v33 = vpop.permute.xlu1 %286  ;;  %512 = vperm.xlu1 %1014, %v1267_v17   ;;  %v396_v34 = vpop.permute.xlu0 %395 }
  0x93   : > { %276 = vperm.xlu0 %1019, %v222_v14   ;;  %v438_v35 = vmul.f32 %v1300_v25, %v396_v34  ;;  %v353_v63 = vmul.f32 %v1297_v24, %v287_v33  ;;  %v247_v14 = vld [vmem:[%s1656_s2 + $0x50] sm:$0xff] }
  0x99   : > { %1016 = vset.pattern.permute.xlu2 %v1089_v18 }
  0x9a   : > { %v307_v36 = vpop.permute.xlu1 %306  ;;  %524 = vperm.xlu1 %1014, %v1274_v19   ;;  %v408_v37 = vpop.permute.xlu0 %407  ;;  %561 = vperm.xlu2 %1016, %v1238_v12  }
  0x9b   : > { %v357_v38 = vmul.f32 %v1297_v24, %v307_v36  ;;  %v1320_v39 = vpop.permute.xlu2 %371  ;;  %301 = vperm.xlu0 %1019, %v227_v15   ;;  %v441_v41 = vmul.f32 %v1300_v25, %v408_v37  ;;  %v361_v37 = vmul.f32 %v1297_v24, %v1302_v26  ;;  %v242_v26 = vld [vmem:[%s1656_s2 + $0x28] sm:$0xff] }
  0x9d   : > { %v1322_v40 = vadd.f32 %v438_v35, %v357_v38 }
  0xa2   : > { %v322_v42 = vpop.permute.xlu1 %321  ;;  %1018 = vset.pattern.permute.xlu1 %v1089_v18  ;;  %v420_v43 = vpop.permute.xlu0 %419  ;;  %573 = vperm.xlu2 %1016, %v1199_v6  }
  0xa3   : > { %v360_v44 = vmul.f32 %v1297_v24, %v322_v42  ;;  %v384_v45 = vpop.permute.xlu2 %383  ;;  %316 = vperm.xlu0 %1019, %v1259_v16   ;;  %569 = vperm.xlu1 %1018, %v1179_v1   ;;  %v444_v51 = vmul.f32 %v1300_v25, %v420_v43 }
  0xa4   : > { %v435_v47 = vmul.f32 %v1300_v25, %v384_v45  ;;  %v243_v45 = vld [vmem:[%s1656_s2 + $0x30] sm:$0xff] }
  0xa5   : > { %v1331_v48 = vadd.f32 %v441_v41, %v360_v44  ;;  %v253_v44 = vld [vmem:[%s1657_s3] sm:$0xff] }
  0xa6   : > { %v1333_v49 = vadd.f32 %v435_v47, %v354_v46 }
  0xaa   : > { %v337_v50 = vpop.permute.xlu1 %336  ;;  %581 = vperm.xlu2 %1016, %v1189_v4   ;;  %v1368_v4 = vperm.slane %v1294_v23, 2 }
  0xab   : > { %v363_v52 = vmul.f32 %v1297_v24, %v337_v50  ;;  %v1338_v53 = vpop.permute.xlu2 %391  ;;  %331 = vperm.xlu0 %1019, %v1267_v17   ;;  %v1341_v54 = vpop.permute.xlu0 %464  ;;  %577 = vperm.xlu1 %1018, %v1174_v0  }
  0xad   : > { %v1344_v55 = vadd.f32 %v444_v51, %v363_v52  ;;  %v364_v52 = vmul.f32 %v1297_v24, %v1312_v32  ;;  %v245_v32 = vld [vmem:[%s1656_s2 + $0x40] sm:$0xff] }
  0xb2   : > { %593 = vperm.xlu2 %1016, %v1207_v7  }
  0xb3   : > { %v1347_v56 = vpop.permute.xlu2 %403  ;;  %346 = vperm.xlu0 %1019, %v1274_v19   ;;  %v485_v57 = vpop.permute.xlu0 %484  ;;  %589 = vperm.xlu1 %1018, %v1194_v5  }
  0xb4   : > { %v1351_v58 = vpop.permute.xlu1 %367 }
  0xba   : > { %605 = vperm.xlu2 %1016, %v1220_v9   ;;  %v533_v9 = vmul.f32 %v1368_v4, %v485_v57 }
  0xbb   : > { %v1357_v60 = vpop.permute.xlu2 %415  ;;  %669 = vperm.xlu0 %1019, %v239_v59   ;;  %v497_v61 = vpop.permute.xlu0 %496  ;;  %601 = vperm.xlu1 %1018, %v1212_v8   ;;  %v355_v8 = vmul.f32 %v1297_v24, %v1281_v21 }
  0xbc   : > { %v380_v62 = vpop.permute.xlu1 %379  ;;  %v536_v28 = vmul.f32 %v1368_v4, %v497_v61 }
  0xbd   : > { %v434_v0 = vmul.f32 %v1300_v25, %v380_v62 }
  0xbf   : > { %v1362_v1 = vadd.f32 %v434_v0, %v353_v63  ;;  %v256_v63 = vld [vmem:[%s1657_s3 + $0x18] sm:$0xff]  ;;  %v246_v0 = vld [vmem:[%s1656_s2 + $0x48] sm:$0xff] }
  0xc2   : > { %617 = vperm.xlu2 %1016, %v1233_v11   ;;  %v238_v11 = vld [vmem:[%s1656_s2 + $0x8] sm:$0xff] }
  0xc3   : > { %v1371_v5 = vpop.permute.xlu2 %427  ;;  %694 = vperm.xlu0 %1019, %v244_v2   ;;  %v509_v6 = vpop.permute.xlu0 %508  ;;  %613 = vperm.xlu1 %1018, %v1225_v10   ;;  %v237_v10 = vld [vmem:[%s1656_s2] sm:$0xff] }
  0xc4   : > { %v388_v7 = vpop.permute.xlu1 %387  ;;  %v539_v42 = vmul.f32 %v1368_v4, %v509_v6 }
  0xc5   : > { %v436_v12 = vmul.f32 %v1300_v25, %v388_v7 }
  0xc7   : > { %v452_v13 = vadd.f32 %v436_v12, %v355_v8  ;;  %v259_v12 = vld [vmem:[%s1657_s3 + $0x30] sm:$0xff] }
  0xc9   : > { %v1387_v15 = vadd.f32 %v533_v9, %v452_v13  ;;  %v249_v13 = vld [vmem:[%s1656_s2 + $0x60] sm:$0xff] }
  0xca   : > { %1021 = vset.pattern.permute.xlu2 %v1087_v3 }
  0xcb   : > { %709 = vperm.xlu0 %1019, %v247_v14   ;;  %v521_v16 = vpop.permute.xlu0 %520  ;;  %1020 = vset.pattern.permute.xlu1 %v1087_v3  ;;  %v473_v17 = vpop.permute.xlu2 %472  ;;  %v250_v3 = vld [vmem:[%s1656_s2 + $0x68] sm:$0xff]  ;;  %v248_v14 = vld [vmem:[%s1656_s2 + $0x58] sm:$0xff] }
  0xcc   : > { %v400_v18 = vpop.permute.xlu1 %399  ;;  %v530_v19 = vmul.f32 %v1368_v4, %v473_v17  ;;  %664 = vperm.xlu2 %1021, %v238_v11   ;;  %659 = vperm.xlu1 %1020, %v237_v10   ;;  %v542_v61 = vmul.f32 %v1368_v4, %v521_v16 }
  0xcd   : > { %v439_v21 = vmul.f32 %v1300_v25, %v400_v18 }
  0xce   : > { %v1396_v27 = vadd.f32 %v530_v19, %v1310_v31 }
  0xcf   : > { %v455_v29 = vadd.f32 %v439_v21, %v358_v20  ;;  %v262_v20 = vld [vmem:[%s1657_s3 + $0x48] sm:$0xff]  ;;  %v252_v21 = vld [vmem:[%s1656_s2 + $0x78] sm:$0xff] }
  0xd1   : > { %v1408_v33 = vadd.f32 %v536_v28, %v455_v29  ;;  %v251_v28 = vld [vmem:[%s1656_s2 + $0x70] sm:$0xff] }
  0xd3   : > { %724 = vperm.xlu0 %1019, %v250_v3   ;;  %v481_v31 = vpop.permute.xlu2 %480 }
  0xd4   : > { %v412_v34 = vpop.permute.xlu1 %411  ;;  %v532_v35 = vmul.f32 %v1368_v4, %v481_v31  ;;  %679 = vperm.xlu2 %1021, %v241_v30   ;;  %v1411_v36 = vpop.permute.xlu0 %565  ;;  %674 = vperm.xlu1 %1020, %v240_v22   ;;  %v255_v30 = vld [vmem:[%s1657_s3 + $0x10] sm:$0xff]  ;;  %v254_v22 = vld [vmem:[%s1657_s3 + $0x8] sm:$0xff]  ;;  %v1496_v31 = vperm.slane %v1294_v23, 3  ;;  %v268_v23 = vld [vmem:[%s1657_s3 + $0x78] sm:$0xff] }
  0xd5   : > { %v442_v38 = vmul.f32 %v1300_v25, %v412_v34 }
  0xd6   : > { %v1417_v41 = vadd.f32 %v532_v35, %v1333_v49 }
  0xd7   : > { %v458_v43 = vadd.f32 %v442_v38, %v361_v37  ;;  %v431_v38 = vmul.f32 %v1300_v25, %v1351_v58  ;;  %v258_v58 = vld [vmem:[%s1657_s3 + $0x28] sm:$0xff] }
  0xd9   : > { %v1429_v46 = vadd.f32 %v539_v42, %v458_v43 }
  0xdb   : > { %771 = vperm.xlu0 %1019, %v253_v44   ;;  %v493_v47 = vpop.permute.xlu2 %492  ;;  %v528_v44 = vmul.f32 %v1368_v4, %v1341_v54 }
  0xdc   : > { %v424_v49 = vpop.permute.xlu1 %423  ;;  %v535_v50 = vmul.f32 %v1368_v4, %v493_v47  ;;  %689 = vperm.xlu2 %1021, %v243_v45   ;;  %v1432_v51 = vpop.permute.xlu0 %585  ;;  %684 = vperm.xlu1 %1020, %v242_v26  }
  0xdd   : > { %v445_v57 = vmul.f32 %v1300_v25, %v424_v49  ;;  %v257_v49 = vld [vmem:[%s1657_s3 + $0x20] sm:$0xff] }
  0xde   : > { %v1438_v59 = vadd.f32 %v535_v50, %v1322_v40 }
  0xdf   : > { %v461_v62 = vadd.f32 %v445_v57, %v364_v52 }
  0xe1   : > { %v1450_v2 = vadd.f32 %v542_v61, %v461_v62  ;;  %v432_v62 = vmul.f32 %v1300_v25, %v1320_v39  ;;  %v626_v39 = vmul.f32 %v1496_v31, %v1411_v36 }
  0xe3   : > { %786 = vperm.xlu0 %1019, %v256_v63   ;;  %v505_v40 = vpop.permute.xlu2 %504 }
  0xe4   : > { %v538_v6 = vmul.f32 %v1368_v4, %v505_v40  ;;  %704 = vperm.xlu2 %1021, %v246_v0   ;;  %v1453_v7 = vpop.permute.xlu0 %597  ;;  %699 = vperm.xlu1 %1020, %v245_v32   ;;  %v469_v8 = vpop.permute.xlu1 %468 }
  0xe5   : > { %v529_v32 = vmul.f32 %v1368_v4, %v469_v8 }
  0xe6   : > { %v1456_v9 = vadd.f32 %v538_v6, %v1331_v48 }
  0xeb   : > { %801 = vperm.xlu0 %1019, %v259_v12   ;;  %v517_v11 = vpop.permute.xlu2 %516  ;;  %v261_v12 = vld [vmem:[%s1657_s3 + $0x40] sm:$0xff] }
  0xec   : > { %v541_v10 = vmul.f32 %v1368_v4, %v517_v11  ;;  %719 = vperm.xlu2 %1021, %v249_v13   ;;  %v1468_v16 = vpop.permute.xlu0 %609  ;;  %714 = vperm.xlu1 %1020, %v248_v14   ;;  %v477_v48 = vpop.permute.xlu1 %476  ;;  %v260_v13 = vld [vmem:[%s1657_s3 + $0x38] sm:$0xff] }
  0xed   : > { %v531_v17 = vmul.f32 %v1368_v4, %v477_v48  ;;  %v437_v48 = vmul.f32 %v1300_v25, %v1338_v53  ;;  %v631_v53 = vmul.f32 %v1496_v31, %v1432_v51 }
  0xee   : > { %v1472_v18 = vadd.f32 %v541_v10, %v1344_v55 }
  0xef   : > { %v547_v19 = vadd.f32 %v531_v17, %v1362_v1  ;;  %v265_v1 = vld [vmem:[%s1657_s3 + $0x60] sm:$0xff] }
  0xf3   : > { %816 = vperm.xlu0 %1019, %v262_v20  }
  0xf4   : > { %734 = vperm.xlu2 %1021, %v252_v21   ;;  %v1484_v29 = vpop.permute.xlu0 %621  ;;  %729 = vperm.xlu1 %1020, %v251_v28   ;;  %v489_v55 = vpop.permute.xlu1 %488  ;;  %v264_v28 = vld [vmem:[%s1657_s3 + $0x58] sm:$0xff] }
  0xf5   : > { %v562_v3 = vpop.permute.xlu2 %561  ;;  %v534_v20 = vmul.f32 %v1368_v4, %v489_v55 }
  0xf6   : > { %v625_v45 = vmul.f32 %v1496_v31, %v562_v3  ;;  %v263_v3 = vld [vmem:[%s1657_s3 + $0x50] sm:$0xff] }
  0xfb   : > { %831 = vperm.xlu0 %1019, %v265_v1  }
  0xfc   : > { %781 = vperm.xlu2 %1021, %v255_v30   ;;  %776 = vperm.xlu1 %1020, %v254_v22   ;;  %v501_v34 = vpop.permute.xlu1 %500 }
  0xfd   : > { %v574_v35 = vpop.permute.xlu2 %573  ;;  %v272_v37 = vpop.permute.xlu0 %271 }
  0xfe   : > { %v628_v42 = vmul.f32 %v1496_v31, %v574_v35  ;;  %v350_v43 = vmul.f32 %v1297_v24, %v272_v37 }
 0x100   : > { %v447_v26 = vadd.f32 %v431_v38, %v350_v43  ;;  %v1508_v47 = vadd.f32 %v628_v42, %v547_v19  ;;  %v537_v43 = vmul.f32 %v1368_v4, %v501_v34 }
 0x102   : > { %v544_v50 = vadd.f32 %v528_v44, %v447_v26 }
 0x103   : > { %846 = vperm.xlu0 %1019, %v268_v23   ;;  %v634_v23 = vmul.f32 %v1496_v31, %v1453_v7 }
 0x104   : > { %796 = vperm.xlu2 %1021, %v258_v58   ;;  %791 = vperm.xlu1 %1020, %v257_v49   ;;  %v513_v54 = vpop.permute.xlu1 %512  ;;  %v1516_v52 = vadd.f32 %v625_v45, %v544_v50  ;;  %v267_v45 = vld [vmem:[%s1657_s3 + $0x70] sm:$0xff]  ;;  %v443_v50 = vmul.f32 %v1300_v25, %v1357_v60 }
 0x105   : > { %v582_v57 = vpop.permute.xlu2 %581  ;;  %v277_v61 = vpop.permute.xlu0 %276 }
 0x106   : > { %v630_v63 = vmul.f32 %v1496_v31, %v582_v57  ;;  %v351_v0 = vmul.f32 %v1297_v24, %v277_v61 }
 0x108   : > { %v448_v40 = vadd.f32 %v432_v62, %v351_v0  ;;  %v1524_v6 = vadd.f32 %v630_v63, %v1387_v15  ;;  %v540_v63 = vmul.f32 %v1368_v4, %v513_v54 }
 0x10a   : > { %v545_v14 = vadd.f32 %v529_v32, %v448_v40  ;;  %v637_v40 = vmul.f32 %v1496_v31, %v1468_v16  ;;  %v640_v16 = vmul.f32 %v1496_v31, %v1484_v29 }
 0x10c   : > { %811 = vperm.xlu2 %1021, %v261_v12   ;;  %806 = vperm.xlu1 %1020, %v260_v13   ;;  %v525_v11 = vpop.permute.xlu1 %524  ;;  %v1534_v8 = vadd.f32 %v626_v39, %v545_v14  ;;  %v446_v39 = vmul.f32 %v1300_v25, %v1371_v5 }
 0x10d   : > { %v594_v10 = vpop.permute.xlu2 %593  ;;  %v302_v15 = vpop.permute.xlu0 %301 }
 0x10e   : > { %v633_v17 = vmul.f32 %v1496_v31, %v594_v10  ;;  %v356_v19 = vmul.f32 %v1297_v24, %v302_v15 }
 0x110   : > { %v453_v21 = vadd.f32 %v437_v48, %v356_v19  ;;  %v1542_v36 = vadd.f32 %v633_v17, %v1408_v33  ;;  %v440_v33 = vmul.f32 %v1300_v25, %v1347_v56  ;;  %v266_v56 = vld [vmem:[%s1657_s3 + $0x68] sm:$0xff] }
 0x112   : > { %v550_v1 = vadd.f32 %v534_v20, %v453_v21 }
 0x114   : > { %826 = vperm.xlu2 %1021, %v264_v28   ;;  %821 = vperm.xlu1 %1020, %v263_v3   ;;  %v1552_v30 = vadd.f32 %v631_v53, %v550_v1 }
 0x115   : > { %v606_v55 = vpop.permute.xlu2 %605  ;;  %v317_v22 = vpop.permute.xlu0 %316 }
 0x116   : > { %v636_v35 = vmul.f32 %v1496_v31, %v606_v55  ;;  %v359_v37 = vmul.f32 %v1297_v24, %v317_v22  ;;  %v570_v38 = vpop.permute.xlu1 %569 }
 0x117   : > { %v627_v42 = vmul.f32 %v1496_v31, %v570_v38 }
 0x118   : > { %v456_v51 = vadd.f32 %v440_v33, %v359_v37  ;;  %v1561_v44 = vadd.f32 %v636_v35, %v1429_v46 }
 0x119   : > { %v643_v26 = vadd.f32 %v627_v42, %v1396_v27 }
 0x11a   : > { %v553_v58 = vadd.f32 %v537_v43, %v456_v51 }
 0x11c   : > { %841 = vperm.xlu2 %1021, %v267_v45   ;;  %836 = vperm.xlu1 %1020, %v266_v56   ;;  %v1572_v34 = vadd.f32 %v634_v23, %v553_v58 }
 0x11d   : > { %v618_v46 = vpop.permute.xlu2 %617  ;;  %v332_v49 = vpop.permute.xlu0 %331 }
 0x11e   : > { %v639_v57 = vmul.f32 %v1496_v31, %v618_v46  ;;  %v362_v61 = vmul.f32 %v1297_v24, %v332_v49  ;;  %v578_v62 = vpop.permute.xlu1 %577 }
 0x11f   : > { %v629_v27 = vmul.f32 %v1496_v31, %v578_v62 }
 0x120   : > { %v459_v7 = vadd.f32 %v443_v50, %v362_v61  ;;  %v1581_v0 = vadd.f32 %v639_v57, %v1450_v2  ;;  %v543_v2 = vmul.f32 %v1368_v4, %v525_v11 }
 0x121   : > { %v645_v32 = vadd.f32 %v629_v27, %v1417_v41 }
 0x122   : > { %v556_v12 = vadd.f32 %v540_v63, %v459_v7 }
 0x124   : > { %v1586_v60 = vadd.f32 %v637_v40, %v556_v12 }
 0x125   : > { %v347_v13 = vpop.permute.xlu0 %346 }
 0x126   : > { %v365_v14 = vmul.f32 %v1297_v24, %v347_v13  ;;  %v590_v10 = vpop.permute.xlu1 %589  ;;  %v665_v48 = vpop.permute.xlu2 %664 }
 0x127   : > { %v632_v54 = vmul.f32 %v1496_v31, %v590_v10 }
 0x128   : > { %v462_v15 = vadd.f32 %v446_v39, %v365_v14 }
 0x129   : > { %v648_v41 = vadd.f32 %v632_v54, %v1438_v59 }
 0x12a   : > { %v559_v17 = vadd.f32 %v543_v2, %v462_v15 }
 0x12c   : > { %v1596_v19 = vadd.f32 %v640_v16, %v559_v17 }
 0x12d   : > { %v670_v21 = vpop.permute.xlu0 %669 }
 0x12e   : > { %v602_v20 = vpop.permute.xlu1 %601  ;;  %v680_v5 = vpop.permute.xlu2 %679  ;;  %v739_v56 = vadd.f32 %v670_v21, %v643_v26 }
 0x12f   : > { %v635_v25 = vmul.f32 %v1496_v31, %v602_v20  ;;  %v741_v27 = vadd.f32 %v680_v5, %v645_v32 }
 0x130   : > { %v755_v50 = vmax.f32 %v739_v56, 0.0 }
 0x131   : > { %v651_v24 = vadd.f32 %v635_v25, %v1456_v9 }
 0x135   : > { %v695_v29 = vpop.permute.xlu0 %694 }
 0x136   : > { %v614_v28 = vpop.permute.xlu1 %613  ;;  %v690_v59 = vpop.permute.xlu2 %689  ;;  %v744_v2 = vadd.f32 %v695_v29, %v648_v41 }
 0x137   : > { %v638_v4 = vmul.f32 %v1496_v31, %v614_v28  ;;  %v743_v26 = vadd.f32 %v690_v59, %v1552_v30 }
 0x139   : > { %v1602_v11 = vadd.f32 %v638_v4, %v1472_v18  ;;  %v738_v18 = vadd.f32 %v665_v48, %v1534_v8  ;;  %v759_v15 = vmax.f32 %v743_v26, 0.0 }
 0x13b   : > { %v754_v23 = vmax.f32 %v738_v18, 0.0 }
 0x13d   : > { %v710_v55 = vpop.permute.xlu0 %709 }
 0x13e   : > { %v660_v3 = vpop.permute.xlu1 %659  ;;  %v705_v1 = vpop.permute.xlu2 %704 }
 0x13f   : > { %v737_v45 = vadd.f32 %v660_v3, %v1516_v52  ;;  %v757_v52 = vmax.f32 %v741_v27, 0.0  ;;  %v746_v21 = vadd.f32 %v705_v1, %v1572_v34  ;;  %v747_v3 = vadd.f32 %v710_v55, %v651_v24 }
 0x141   : > { %v753_v58 = vmax.f32 %v737_v45, 0.0 }
 0x145   : > { %v1604_v35 = vpop.permute.xlu0 %724 }
 0x146   : > { %v675_v53 = vpop.permute.xlu1 %674  ;;  %v720_v33 = vpop.permute.xlu2 %719 }
 0x147   : > { %v740_v46 = vadd.f32 %v675_v53, %v1508_v47  ;;  %v762_v53 = vmax.f32 %v746_v21, 0.0 }
 0x149   : > { %v756_v63 = vmax.f32 %v740_v46, 0.0 }
 0x14d   : > { %v772_v38 = vpop.permute.xlu0 %771 }
 0x14e   : > { %v685_v22 = vpop.permute.xlu1 %684  ;;  %v1606_v9 = vpop.permute.xlu2 %734  ;;  %v849_v57 = vmul.f32 %v772_v38, %v753_v58 }
 0x14f   : > { %v742_v13 = vadd.f32 %v685_v22, %v1524_v6  ;;  %v760_v6 = vmax.f32 %v744_v2, 0.0 }
 0x151   : > { %v758_v47 = vmax.f32 %v742_v13, 0.0 }
 0x155   : > { %v787_v51 = vpop.permute.xlu0 %786 }
 0x156   : > { %v700_v37 = vpop.permute.xlu1 %699  ;;  %v782_v43 = vpop.permute.xlu2 %781  ;;  %v852_v8 = vmul.f32 %v787_v51, %v756_v63 }
 0x157   : > { %v851_v7 = vmul.f32 %v782_v43, %v755_v50  ;;  %v745_v17 = vadd.f32 %v700_v37, %v1542_v36  ;;  %v763_v36 = vmax.f32 %v747_v3, 0.0  ;;  %v749_v37 = vadd.f32 %v720_v33, %v1586_v60 }
 0x158   : > { %v752_v50 = vadd.f32 %v1606_v9, %v1596_v19 }
 0x159   : > { %v761_v30 = vmax.f32 %v745_v17, 0.0  ;;  %v765_v24 = vmax.f32 %v749_v37, 0.0 }
 0x15d   : > { %v802_v12 = vpop.permute.xlu0 %801 }
 0x15e   : > { %v715_v42 = vpop.permute.xlu1 %714  ;;  %v797_v62 = vpop.permute.xlu2 %796  ;;  %v855_v20 = vmul.f32 %v802_v12, %v759_v15 }
 0x15f   : > { %v854_v16 = vmul.f32 %v797_v62, %v758_v47  ;;  %v748_v29 = vadd.f32 %v715_v42, %v1561_v44 }
 0x161   : > { %v764_v34 = vmax.f32 %v748_v29, 0.0 }
 0x165   : > { %v817_v5 = vpop.permute.xlu0 %816 }
 0x166   : > { %v730_v31 = vpop.permute.xlu1 %729  ;;  %v812_v32 = vpop.permute.xlu2 %811  ;;  %v858_v38 = vmul.f32 %v817_v5, %v762_v53 }
 0x167   : > { %v857_v22 = vmul.f32 %v812_v32, %v761_v30  ;;  %v751_v46 = vadd.f32 %v730_v31, %v1581_v0 }
 0x16d   : > { %v832_v45 = vpop.permute.xlu0 %831 }
 0x16e   : > { %v777_v49 = vpop.permute.xlu1 %776  ;;  %v827_v51 = vpop.permute.xlu2 %826  ;;  %v861_v44 = vmul.f32 %v832_v45, %v765_v24 }
 0x16f   : > { %v850_v61 = vmul.f32 %v777_v49, %v754_v23  ;;  %v750_v23 = vadd.f32 %v1604_v35, %v1602_v11  ;;  %v860_v55 = vmul.f32 %v827_v51, %v764_v34  ;;  %v768_v11 = vmax.f32 %v752_v50, 0.0 }
 0x171   : > { %v865_v40 = vadd.f32 %v850_v61, %v849_v57  ;;  %v766_v49 = vmax.f32 %v750_v23, 0.0  ;;  %v767_v61 = vmax.f32 %v751_v46, 0.0 }
 0x173   : > { %v866_v39 = vadd.f32 %v865_v40, %v851_v7 }
 0x175   : > { %v867_v14 = vadd.f32 %v866_v39, %v852_v8  ;;  %v847_v27 = vpop.permute.xlu0 %846  ;;  %v887_v8 = vstv %s886_s27 }
 0x176   : > { %v792_v10 = vpop.permute.xlu1 %791  ;;  %v842_v33 = vpop.permute.xlu2 %841  ;;  %v864_v7 = vmul.f32 %v847_v27, %v768_v11 }
 0x177   : > { %v853_v54 = vmul.f32 %v792_v10, %v757_v52  ;;  %v863_v35 = vmul.f32 %v842_v33, %v767_v61 }
 0x179   : > { %v868_v48 = vadd.f32 %v867_v14, %v853_v54 }
 0x17b   : > { %v869_v25 = vadd.f32 %v868_v48, %v854_v16 }
 0x17d   : > { %v870_v28 = vadd.f32 %v869_v25, %v855_v20 }
 0x17e   : > { %v807_v4 = vpop.permute.xlu1 %806 }
 0x17f   : > { %v856_v59 = vmul.f32 %v807_v4, %v760_v6 }
 0x181   : > { %v871_v41 = vadd.f32 %v870_v28, %v856_v59 }
 0x183   : > { %v872_v43 = vadd.f32 %v871_v41, %v857_v22 }
 0x185   : > { %v873_v18 = vadd.f32 %v872_v43, %v858_v38 }
 0x186   : > { %v822_v56 = vpop.permute.xlu1 %821 }
 0x187   : > { %v859_v1 = vmul.f32 %v822_v56, %v763_v36 }
 0x189   : > { %v874_v58 = vadd.f32 %v873_v18, %v859_v1 }
 0x18b   : > { %v875_v42 = vadd.f32 %v874_v58, %v860_v55 }
 0x18d   : > { %v876_v60 = vadd.f32 %v875_v42, %v861_v44 }
 0x18e   : > { %v837_v57 = vpop.permute.xlu1 %836 }
 0x18f   : > { %v862_v62 = vmul.f32 %v837_v57, %v766_v49 }
 0x191   : > { %v877_v63 = vadd.f32 %v876_v60, %v862_v62 }
 0x193   : > { %v878_v40 = vadd.f32 %v877_v63, %v863_v35 }
 0x195   : > { %v879_v0 = vadd.f32 %v878_v40, %v864_v7 }
 0x197   : > { %v880_v31 = vrot.slane %v879_v0, 4 }
 0x199   : > { %v881_v12 = vadd.f32 %v880_v31, %v879_v0 }
 0x19b   : > { %v882_v13 = vrot.slane %v881_v12, 2 }
 0x19d   : > { %v883_v19 = vadd.f32 %v882_v13, %v881_v12 }
 0x19f   : > { %v884_v9 = vrot.slane %v883_v19, 1 }
 0x1a1   : > { %v885_v39 = vadd.f32 %v884_v9, %v883_v19 }
 0x1a3   : > { %v888_v52 = vadd.f32 %v887_v8, %v885_v39 }
 0x1a5   : > { %889 = vst [vmem:[%s215_s10] sm:$0x1] %v888_v52 }
 0x1a6   : > { %1049 = shalt.err (!%p1046_p3)
}
 0x1a7   : > { %965 = dma.vmem_to_hbm [thread:$0]  (%p1161_p5), %s902_s11, 16, %s904_s12, %s891_s13  }
 0x1a8 PF: > { %p971_p4 = scmp.ge.s32.totalorder %s1084_s23, 2  ;;  %s915_s24 = sand.u32 1, %s1072_s20  }
 0x1a9   : > { %s916_s26 = scalar_lea.sflag [#allocation4], %s915_s24 }
 0x1aa   : > { %p968_p7 = pnand %p971_p4, %p1165_p6 }
 0x1ac   : > { %p969_p8 = pneg %p968_p7 }
 0x1ae   : > { %1067 = dma.done.wait (%p969_p8), %s916_s26, 16  }
 0x1af   : > { %1069 = vsyncadd (%p969_p8), %s916_s26, 4294967280  ;;  %p16_p9 = scmp.ge.s32.totalorder %s1148_s25, 4   ;;  %s1662_s20 = smov %s1076_s21 }
 0x1b0   : > { %s1663_s21 = smov %s1080_s22  ;;  %s1664_s22 = smov %s1159_s28 }
 0x1b1   : > { %s1665_s23 = smov %s1148_s25  ;;  %18 = sbr.rel (!%p16_p9) target bundleno = 5 (0x5), region = 75 }
 0x1b6   :  { %921 = vsyncpa [#allocation4], 1 }
 0x1b7   :  { %923 = vsyncpa [#allocation4 + $0x1], 1 }

</bundles_post_ra>
